<compile_context>
chip_gen: v5e
topology: v5e:2x2
jax: 0.10.0
libtpu: 0.0.40
codegen_flags: <defaults>
</compile_context>

<pallas_src>
from functools import partial

import jax
import jax.numpy as jnp
from jax import lax
from jax.experimental import pallas as pl
from jax.experimental.pallas import tpu as pltpu


MXU_DTYPE = jnp.bfloat16     # jnp.float32 for strict numerics (matches ref to ~2e-3)


def _lane_roll_left(x, s):
    """y[..., p] = x[..., (p + s) % size] for a static Python int s."""
    size = x.shape[-1]
    s = s % size
    if s == 0:
        return x
    return jnp.concatenate((x[:, s:], x[:, :s]), axis=1)


# ----------------------------------------------------------------------------
# Pallas kernel: one image per grid step, channel-major (C, P = H*W) tiles.
# ----------------------------------------------------------------------------
def mbconv_kernel(x_ref, masks_ref, w1_ref, b1_ref, wd_ref, bd_ref,
                  w2_ref, b2_ref, o_ref, *, W):
    x = x_ref[0]                                   # (Cin, P), lane-dense

    # --- inverted_conv: 1x1 conv (channel-major MXU matmul) + BN + ReLU6 -----
    mid = jnp.dot(w1_ref[...], x, preferred_element_type=jnp.float32)  # (Cmid, P)
    mid = jnp.clip(mid + b1_ref[...], 0.0, 6.0)

    # --- depth_conv: 3x3 depthwise, stride 1, pad 1 + BN + ReLU6 -------------
    # Each neighbour tap is a lane roll of the resident (Cmid, P) activation;
    # taps that fall outside the image (incl. circular wrap) are zeroed by the
    # precomputed per-tap (1, P) masks.  Two partial accumulators for ILP.
    acc_a = mid * wd_ref[:, 4:5] + bd_ref[...]     # center tap + folded BN bias
    acc_b = None
    tap_i = 0
    for oh in (-1, 0, 1):
        for ow in (-1, 0, 1):
            if oh == 0 and ow == 0:
                continue
            s = oh * W + ow                        # flat lane offset of this tap
            k = (oh + 1) * 3 + (ow + 1)            # depthwise weight index
            tap = _lane_roll_left(mid, s)          # tap[p] = mid[(p + s) % P]
            term = (tap * masks_ref[tap_i:tap_i + 1, :]) * wd_ref[:, k:k + 1]
            if tap_i % 2 == 0:
                acc_b = term if acc_b is None else acc_b + term
            else:
                acc_a = acc_a + term
            tap_i += 1
    acc = jnp.clip(acc_a + acc_b, 0.0, 6.0)        # (Cmid, P), f32

    # --- point_conv: 1x1 conv (MXU matmul) + BN, no activation ---------------
    out = jnp.dot(w2_ref[...], acc.astype(w2_ref.dtype),
                  preferred_element_type=jnp.float32)                 # (Cout, P)
    o_ref[0] = out + b2_ref[...]                   # lane-dense store


# ----------------------------------------------------------------------------
# Host-side helpers
# ----------------------------------------------------------------------------
def make_tap_masks(H, W):
    """(8, H*W) f32 validity masks, one pre-combined mask per non-center tap."""
    P = H * W
    pos = jnp.arange(P, dtype=jnp.int32)
    w_pos = pos % W
    h_pos = pos // W
    masks = []
    for oh in (-1, 0, 1):
        for ow in (-1, 0, 1):
            if oh == 0 and ow == 0:
                continue
            ok = jnp.ones((P,), jnp.bool_)
            if ow == -1:
                ok = ok & (w_pos >= 1)
            elif ow == 1:
                ok = ok & (w_pos <= W - 2)
            if oh == -1:
                ok = ok & (h_pos >= 1)
            elif oh == 1:
                ok = ok & (h_pos <= H - 2)
            masks.append(ok)
    return jnp.stack(masks, axis=0).astype(jnp.float32)


# ----------------------------------------------------------------------------
# Wrapper: PyTorch NCHW in / NCHW out (no transposes -- reshapes only).
# ----------------------------------------------------------------------------
def mbconv_pallas(x_nchw, w1, b1, wd, bd, w2, b2):
    N, Cin, H, W = x_nchw.shape
    Cmid, Cout = w1.shape[0], w2.shape[0]
    P = H * W

    # NCHW is channel-major per image: free reshape to (N, Cin, H*W).
    x = x_nchw.reshape(N, Cin, P).astype(MXU_DTYPE)
    masks = make_tap_masks(H, W)                   # (8, P) f32

    flops = 2 * N * P * (Cin * Cmid + 9 * Cmid + Cmid * Cout)
    bytes_accessed = int(
        x.size * x.dtype.itemsize + masks.size * 4
        + w1.size * w1.dtype.itemsize + b1.size * 4
        + wd.size * 4 + bd.size * 4
        + w2.size * w2.dtype.itemsize + b2.size * 4
        + N * Cout * P * 4)

    const2 = lambda n: (0, 0)                      # weights stay VMEM-resident
    out = pl.pallas_call(
        partial(mbconv_kernel, W=W),
        out_shape=jax.ShapeDtypeStruct((N, Cout, P), jnp.float32),
        grid=(N,),
        in_specs=[
            pl.BlockSpec((1, Cin, P), lambda n: (n, 0, 0)),   # activations
            pl.BlockSpec((8, P), const2),                     # tap masks
            pl.BlockSpec((Cmid, Cin), const2),                # w1 (bf16)
            pl.BlockSpec((Cmid, 1), const2),                  # b1
            pl.BlockSpec((Cmid, 9), const2),                  # wd
            pl.BlockSpec((Cmid, 1), const2),                  # bd
            pl.BlockSpec((Cout, Cmid), const2),               # w2 (bf16)
            pl.BlockSpec((Cout, 1), const2),                  # b2
        ],
        out_specs=pl.BlockSpec((1, Cout, P), lambda n: (n, 0, 0)),
        compiler_params=pltpu.CompilerParams(
            dimension_semantics=("parallel",)),
        cost_estimate=pl.CostEstimate(flops=flops, transcendentals=0,
                                      bytes_accessed=bytes_accessed),
    )(x, masks, w1, b1, wd, bd, w2, b2)

    return out.reshape(N, Cout, H, W)              # free reshape back to NCHW


# ----------------------------------------------------------------------------
# Parameter setup (deterministic, matches PyTorch module __init__ shapes)
# ----------------------------------------------------------------------------
def make_params(key, in_channels, out_channels, expand_ratio=6, ksize=3):
    mid = int(round(in_channels * expand_ratio))
    keys = jax.random.split(key, 15)

    def bn_params(k0, k1, k2, k3, c):
        gamma = jax.random.uniform(k0, (c,), jnp.float32, 0.5, 1.5)
        beta = 0.1 * jax.random.normal(k1, (c,), jnp.float32)
        mean = 0.1 * jax.random.normal(k2, (c,), jnp.float32)
        var = jax.random.uniform(k3, (c,), jnp.float32, 0.5, 1.5)
        return gamma, beta, mean, var

    # Conv weights in PyTorch layout (O, I/groups, kh, kw), no conv bias.
    w1_pt = 0.1 * jax.random.normal(keys[0], (mid, in_channels, 1, 1), jnp.float32)
    bn1 = bn_params(keys[1], keys[2], keys[3], keys[4], mid)
    wd_pt = 0.1 * jax.random.normal(keys[5], (mid, 1, ksize, ksize), jnp.float32)
    bn2 = bn_params(keys[6], keys[7], keys[8], keys[9], mid)
    w2_pt = 0.1 * jax.random.normal(keys[10], (out_channels, mid, 1, 1), jnp.float32)
    bn3 = bn_params(keys[11], keys[12], keys[13], keys[14], out_channels)
    return (w1_pt, bn1, wd_pt, bn2, w2_pt, bn3)


def fold_params(raw, eps=1e-5):
    """Fold eval-mode BatchNorm into the preceding conv; channel-major layout."""
    w1_pt, (g1, be1, m1, v1), wd_pt, (g2, be2, m2, v2), w2_pt, (g3, be3, m3, v3) = raw

    s1 = g1 / jnp.sqrt(v1 + eps)
    w1 = (w1_pt[:, :, 0, 0] * s1[:, None]).astype(MXU_DTYPE)        # (Cmid, Cin)
    b1 = (be1 - m1 * s1)[:, None]                                    # (Cmid, 1)

    s2 = g2 / jnp.sqrt(v2 + eps)
    wd = wd_pt[:, 0].reshape(wd_pt.shape[0], 9) * s2[:, None]        # (Cmid, 9)
    bd = (be2 - m2 * s2)[:, None]                                    # (Cmid, 1)

    s3 = g3 / jnp.sqrt(v3 + eps)
    w2 = (w2_pt[:, :, 0, 0] * s3[:, None]).astype(MXU_DTYPE)         # (Cout, Cmid)
    b2 = (be3 - m3 * s3)[:, None]                                    # (Cout, 1)
    return w1, b1, wd, bd, w2, b2


# ----------------------------------------------------------------------------
# Pure-JAX reference (eval-mode BN, un-folded, f32 HIGHEST) for verification
# ----------------------------------------------------------------------------
def mbconv_reference(x_nhwc, raw, eps=1e-5):
    w1_pt, (g1, be1, m1, v1), wd_pt, (g2, be2, m2, v2), w2_pt, (g3, be3, m3, v3) = raw

    def bn(x, g, b, m, v):
        return (x - m) / jnp.sqrt(v + eps) * g + b

    dn = ("NHWC", "HWIO", "NHWC")
    hp = lax.Precision.HIGHEST

    y = lax.conv_general_dilated(x_nhwc, jnp.transpose(w1_pt, (2, 3, 1, 0)),
                                 (1, 1), "VALID", dimension_numbers=dn, precision=hp)
    y = jnp.clip(bn(y, g1, be1, m1, v1), 0.0, 6.0)

    cmid = wd_pt.shape[0]
    y = lax.conv_general_dilated(y, jnp.transpose(wd_pt, (2, 3, 1, 0)),
                                 (1, 1), "SAME", dimension_numbers=dn,
                                 feature_group_count=cmid, precision=hp)
    y = jnp.clip(bn(y, g2, be2, m2, v2), 0.0, 6.0)

    y = lax.conv_general_dilated(y, jnp.transpose(w2_pt, (2, 3, 1, 0)),
                                 (1, 1), "VALID", dimension_numbers=dn, precision=hp)
    y = bn(y, g3, be3, m3, v3)
    return y


# ----------------------------------------------------------------------------
if __name__ == "__main__":
    key = jax.random.PRNGKey(0)
    k_x, k_p = jax.random.split(key)

    N, Cin, H, W = 2, 4, 16, 16
    Cout = 8
    expand_ratio = 6                      # -> Cmid = 24

    x_nchw = jax.random.normal(k_x, (N, Cin, H, W), jnp.float32)

    raw = make_params(k_p, Cin, Cout, expand_ratio)
    params = fold_params(raw)

    out_nchw = mbconv_pallas(x_nchw, *params)
    jax.block_until_ready(out_nchw)

    ref_nhwc = mbconv_reference(jnp.transpose(x_nchw, (0, 2, 3, 1)), raw)
    ref_nchw = jnp.transpose(ref_nhwc, (0, 3, 1, 2))

    assert out_nchw.shape == (N, Cout, H, W)
    # Tolerance accounts for bf16 MXU operands (f32 accumulation); with
    # MXU_DTYPE = jnp.float32 the kernel matches the reference to ~2e-3.
    assert jnp.allclose(out_nchw, ref_nchw, rtol=3e-2, atol=3e-2), (
        float(jnp.max(jnp.abs(out_nchw - ref_nchw))))

    print("KERNEL_OK")
</pallas_src>

<mosaic_0001>
module attributes {stable_mosaic.version = 11 : i64} {
  func.func @mbconv_kernel(%arg0: i32, %arg1: memref<1x4x256xbf16, #tpu.memory_space<vmem>>, %arg2: memref<8x256xf32, #tpu.memory_space<vmem>>, %arg3: memref<24x4xbf16, #tpu.memory_space<vmem>>, %arg4: memref<24x1xf32, #tpu.memory_space<vmem>>, %arg5: memref<24x9xf32, #tpu.memory_space<vmem>>, %arg6: memref<24x1xf32, #tpu.memory_space<vmem>>, %arg7: memref<8x24xbf16, #tpu.memory_space<vmem>>, %arg8: memref<8x1xf32, #tpu.memory_space<vmem>>, %arg9: memref<1x8x256xf32, #tpu.memory_space<vmem>>) attributes {dimension_semantics = [#tpu.dimension_semantics<parallel>], iteration_bounds = array<i64: 2>, scalar_prefetch = 0 : i64, scratch_operands = 0 : i64, tpu.core_type = #tpu.core_type<tc>, window_params = [{transform_indices = @transform_0, window_bounds = array<i64: 1, 4, 256>}, {pipeline_mode = #tpu.pipeline_mode<synchronous>, transform_indices = @transform_1, window_bounds = array<i64: 8, 256>}, {pipeline_mode = #tpu.pipeline_mode<synchronous>, transform_indices = @transform_2, window_bounds = array<i64: 24, 4>}, {pipeline_mode = #tpu.pipeline_mode<synchronous>, transform_indices = @transform_3, window_bounds = array<i64: 24, 1>}, {pipeline_mode = #tpu.pipeline_mode<synchronous>, transform_indices = @transform_4, window_bounds = array<i64: 24, 9>}, {pipeline_mode = #tpu.pipeline_mode<synchronous>, transform_indices = @transform_5, window_bounds = array<i64: 24, 1>}, {pipeline_mode = #tpu.pipeline_mode<synchronous>, transform_indices = @transform_6, window_bounds = array<i64: 8, 24>}, {pipeline_mode = #tpu.pipeline_mode<synchronous>, transform_indices = @transform_7, window_bounds = array<i64: 8, 1>}, {transform_indices = @transform_8, window_bounds = array<i64: 1, 8, 256>}]} {
    %c0 = arith.constant 0 : index
    %c0_0 = arith.constant 0 : index
    %c0_1 = arith.constant 0 : index
    %0 = vector.load %arg1[%c0, %c0_0, %c0_1] : memref<1x4x256xbf16, #tpu.memory_space<vmem>>, vector<1x4x256xbf16>
    %1 = vector.shape_cast %0 : vector<1x4x256xbf16> to vector<4x256xbf16>
    %c0_2 = arith.constant 0 : index
    %c0_3 = arith.constant 0 : index
    %2 = vector.load %arg3[%c0_2, %c0_3] : memref<24x4xbf16, #tpu.memory_space<vmem>>, vector<24x4xbf16>
    %cst = arith.constant dense<0.000000e+00> : vector<24x256xf32>
    %3 = tpu.matmul %2, %1, %cst {dimension_numbers = #tpu.dot_dimension_numbers<[1], [0], [0], [1], [0, 0, 1, 1], [], []>} : vector<24x4xbf16>, vector<4x256xbf16>, vector<24x256xf32> -> vector<24x256xf32>
    %c0_4 = arith.constant 0 : index
    %c0_5 = arith.constant 0 : index
    %4 = vector.load %arg4[%c0_4, %c0_5] : memref<24x1xf32, #tpu.memory_space<vmem>>, vector<24x1xf32>
    %5 = vector.broadcast %4 : vector<24x1xf32> to vector<24x256xf32>
    %6 = arith.addf %3, %5 : vector<24x256xf32>
    %cst_6 = arith.constant 0.000000e+00 : f32
    %cst_7 = arith.constant 6.000000e+00 : f32
    %7 = vector.broadcast %cst_6 : f32 to vector<24x256xf32>
    %8 = arith.maximumf %7, %6 : vector<24x256xf32>
    %9 = vector.broadcast %cst_7 : f32 to vector<24x256xf32>
    %10 = arith.minimumf %9, %8 : vector<24x256xf32>
    %c0_8 = arith.constant 0 : index
    %c4 = arith.constant 4 : index
    %11 = vector.load %arg5[%c0_8, %c4] : memref<24x9xf32, #tpu.memory_space<vmem>>, vector<24x1xf32>
    %12 = vector.broadcast %11 : vector<24x1xf32> to vector<24x256xf32>
    %13 = arith.mulf %10, %12 : vector<24x256xf32>
    %c0_9 = arith.constant 0 : index
    %c0_10 = arith.constant 0 : index
    %14 = vector.load %arg6[%c0_9, %c0_10] : memref<24x1xf32, #tpu.memory_space<vmem>>, vector<24x1xf32>
    %15 = vector.broadcast %14 : vector<24x1xf32> to vector<24x256xf32>
    %16 = arith.addf %13, %15 : vector<24x256xf32>
    %17 = vector.extract_strided_slice %10 {offsets = [0, 239], sizes = [24, 17], strides = [1, 1]} : vector<24x256xf32> to vector<24x17xf32>
    %18 = vector.extract_strided_slice %10 {offsets = [0, 0], sizes = [24, 239], strides = [1, 1]} : vector<24x256xf32> to vector<24x239xf32>
    %19 = tpu.concatenate %17, %18 in 1 : vector<24x17xf32>, vector<24x239xf32> -> vector<24x256xf32>
    %c0_11 = arith.constant 0 : index
    %c0_12 = arith.constant 0 : index
    %20 = vector.load %arg2[%c0_11, %c0_12] : memref<8x256xf32, #tpu.memory_space<vmem>>, vector<1x256xf32>
    %21 = vector.broadcast %20 : vector<1x256xf32> to vector<24x256xf32>
    %22 = arith.mulf %19, %21 : vector<24x256xf32>
    %c0_13 = arith.constant 0 : index
    %c0_14 = arith.constant 0 : index
    %23 = vector.load %arg5[%c0_13, %c0_14] : memref<24x9xf32, #tpu.memory_space<vmem>>, vector<24x1xf32>
    %24 = vector.broadcast %23 : vector<24x1xf32> to vector<24x256xf32>
    %25 = arith.mulf %22, %24 : vector<24x256xf32>
    %26 = vector.extract_strided_slice %10 {offsets = [0, 240], sizes = [24, 16], strides = [1, 1]} : vector<24x256xf32> to vector<24x16xf32>
    %27 = vector.extract_strided_slice %10 {offsets = [0, 0], sizes = [24, 240], strides = [1, 1]} : vector<24x256xf32> to vector<24x240xf32>
    %28 = tpu.concatenate %26, %27 in 1 : vector<24x16xf32>, vector<24x240xf32> -> vector<24x256xf32>
    %c1 = arith.constant 1 : index
    %c0_15 = arith.constant 0 : index
    %29 = vector.load %arg2[%c1, %c0_15] : memref<8x256xf32, #tpu.memory_space<vmem>>, vector<1x256xf32>
    %30 = vector.broadcast %29 : vector<1x256xf32> to vector<24x256xf32>
    %31 = arith.mulf %28, %30 : vector<24x256xf32>
    %c0_16 = arith.constant 0 : index
    %c1_17 = arith.constant 1 : index
    %32 = vector.load %arg5[%c0_16, %c1_17] : memref<24x9xf32, #tpu.memory_space<vmem>>, vector<24x1xf32>
    %33 = vector.broadcast %32 : vector<24x1xf32> to vector<24x256xf32>
    %34 = arith.mulf %31, %33 : vector<24x256xf32>
    %35 = arith.addf %16, %34 : vector<24x256xf32>
    %36 = vector.extract_strided_slice %10 {offsets = [0, 241], sizes = [24, 15], strides = [1, 1]} : vector<24x256xf32> to vector<24x15xf32>
    %37 = vector.extract_strided_slice %10 {offsets = [0, 0], sizes = [24, 241], strides = [1, 1]} : vector<24x256xf32> to vector<24x241xf32>
    %38 = tpu.concatenate %36, %37 in 1 : vector<24x15xf32>, vector<24x241xf32> -> vector<24x256xf32>
    %c2 = arith.constant 2 : index
    %c0_18 = arith.constant 0 : index
    %39 = vector.load %arg2[%c2, %c0_18] : memref<8x256xf32, #tpu.memory_space<vmem>>, vector<1x256xf32>
    %40 = vector.broadcast %39 : vector<1x256xf32> to vector<24x256xf32>
    %41 = arith.mulf %38, %40 : vector<24x256xf32>
    %c0_19 = arith.constant 0 : index
    %c2_20 = arith.constant 2 : index
    %42 = vector.load %arg5[%c0_19, %c2_20] : memref<24x9xf32, #tpu.memory_space<vmem>>, vector<24x1xf32>
    %43 = vector.broadcast %42 : vector<24x1xf32> to vector<24x256xf32>
    %44 = arith.mulf %41, %43 : vector<24x256xf32>
    %45 = arith.addf %25, %44 : vector<24x256xf32>
    %46 = vector.extract_strided_slice %10 {offsets = [0, 255], sizes = [24, 1], strides = [1, 1]} : vector<24x256xf32> to vector<24x1xf32>
    %47 = vector.extract_strided_slice %10 {offsets = [0, 0], sizes = [24, 255], strides = [1, 1]} : vector<24x256xf32> to vector<24x255xf32>
    %48 = tpu.concatenate %46, %47 in 1 : vector<24x1xf32>, vector<24x255xf32> -> vector<24x256xf32>
    %c3 = arith.constant 3 : index
    %c0_21 = arith.constant 0 : index
    %49 = vector.load %arg2[%c3, %c0_21] : memref<8x256xf32, #tpu.memory_space<vmem>>, vector<1x256xf32>
    %50 = vector.broadcast %49 : vector<1x256xf32> to vector<24x256xf32>
    %51 = arith.mulf %48, %50 : vector<24x256xf32>
    %c0_22 = arith.constant 0 : index
    %c3_23 = arith.constant 3 : index
    %52 = vector.load %arg5[%c0_22, %c3_23] : memref<24x9xf32, #tpu.memory_space<vmem>>, vector<24x1xf32>
    %53 = vector.broadcast %52 : vector<24x1xf32> to vector<24x256xf32>
    %54 = arith.mulf %51, %53 : vector<24x256xf32>
    %55 = arith.addf %35, %54 : vector<24x256xf32>
    %56 = vector.extract_strided_slice %10 {offsets = [0, 1], sizes = [24, 255], strides = [1, 1]} : vector<24x256xf32> to vector<24x255xf32>
    %57 = vector.extract_strided_slice %10 {offsets = [0, 0], sizes = [24, 1], strides = [1, 1]} : vector<24x256xf32> to vector<24x1xf32>
    %58 = tpu.concatenate %56, %57 in 1 : vector<24x255xf32>, vector<24x1xf32> -> vector<24x256xf32>
    %c4_24 = arith.constant 4 : index
    %c0_25 = arith.constant 0 : index
    %59 = vector.load %arg2[%c4_24, %c0_25] : memref<8x256xf32, #tpu.memory_space<vmem>>, vector<1x256xf32>
    %60 = vector.broadcast %59 : vector<1x256xf32> to vector<24x256xf32>
    %61 = arith.mulf %58, %60 : vector<24x256xf32>
    %c0_26 = arith.constant 0 : index
    %c5 = arith.constant 5 : index
    %62 = vector.load %arg5[%c0_26, %c5] : memref<24x9xf32, #tpu.memory_space<vmem>>, vector<24x1xf32>
    %63 = vector.broadcast %62 : vector<24x1xf32> to vector<24x256xf32>
    %64 = arith.mulf %61, %63 : vector<24x256xf32>
    %65 = arith.addf %45, %64 : vector<24x256xf32>
    %66 = vector.extract_strided_slice %10 {offsets = [0, 15], sizes = [24, 241], strides = [1, 1]} : vector<24x256xf32> to vector<24x241xf32>
    %67 = vector.extract_strided_slice %10 {offsets = [0, 0], sizes = [24, 15], strides = [1, 1]} : vector<24x256xf32> to vector<24x15xf32>
    %68 = tpu.concatenate %66, %67 in 1 : vector<24x241xf32>, vector<24x15xf32> -> vector<24x256xf32>
    %c5_27 = arith.constant 5 : index
    %c0_28 = arith.constant 0 : index
    %69 = vector.load %arg2[%c5_27, %c0_28] : memref<8x256xf32, #tpu.memory_space<vmem>>, vector<1x256xf32>
    %70 = vector.broadcast %69 : vector<1x256xf32> to vector<24x256xf32>
    %71 = arith.mulf %68, %70 : vector<24x256xf32>
    %c0_29 = arith.constant 0 : index
    %c6 = arith.constant 6 : index
    %72 = vector.load %arg5[%c0_29, %c6] : memref<24x9xf32, #tpu.memory_space<vmem>>, vector<24x1xf32>
    %73 = vector.broadcast %72 : vector<24x1xf32> to vector<24x256xf32>
    %74 = arith.mulf %71, %73 : vector<24x256xf32>
    %75 = arith.addf %55, %74 : vector<24x256xf32>
    %76 = vector.extract_strided_slice %10 {offsets = [0, 16], sizes = [24, 240], strides = [1, 1]} : vector<24x256xf32> to vector<24x240xf32>
    %77 = vector.extract_strided_slice %10 {offsets = [0, 0], sizes = [24, 16], strides = [1, 1]} : vector<24x256xf32> to vector<24x16xf32>
    %78 = tpu.concatenate %76, %77 in 1 : vector<24x240xf32>, vector<24x16xf32> -> vector<24x256xf32>
    %c6_30 = arith.constant 6 : index
    %c0_31 = arith.constant 0 : index
    %79 = vector.load %arg2[%c6_30, %c0_31] : memref<8x256xf32, #tpu.memory_space<vmem>>, vector<1x256xf32>
    %80 = vector.broadcast %79 : vector<1x256xf32> to vector<24x256xf32>
    %81 = arith.mulf %78, %80 : vector<24x256xf32>
    %c0_32 = arith.constant 0 : index
    %c7 = arith.constant 7 : index
    %82 = vector.load %arg5[%c0_32, %c7] : memref<24x9xf32, #tpu.memory_space<vmem>>, vector<24x1xf32>
    %83 = vector.broadcast %82 : vector<24x1xf32> to vector<24x256xf32>
    %84 = arith.mulf %81, %83 : vector<24x256xf32>
    %85 = arith.addf %65, %84 : vector<24x256xf32>
    %86 = vector.extract_strided_slice %10 {offsets = [0, 17], sizes = [24, 239], strides = [1, 1]} : vector<24x256xf32> to vector<24x239xf32>
    %87 = vector.extract_strided_slice %10 {offsets = [0, 0], sizes = [24, 17], strides = [1, 1]} : vector<24x256xf32> to vector<24x17xf32>
    %88 = tpu.concatenate %86, %87 in 1 : vector<24x239xf32>, vector<24x17xf32> -> vector<24x256xf32>
    %c7_33 = arith.constant 7 : index
    %c0_34 = arith.constant 0 : index
    %89 = vector.load %arg2[%c7_33, %c0_34] : memref<8x256xf32, #tpu.memory_space<vmem>>, vector<1x256xf32>
    %90 = vector.broadcast %89 : vector<1x256xf32> to vector<24x256xf32>
    %91 = arith.mulf %88, %90 : vector<24x256xf32>
    %c0_35 = arith.constant 0 : index
    %c8 = arith.constant 8 : index
    %92 = vector.load %arg5[%c0_35, %c8] : memref<24x9xf32, #tpu.memory_space<vmem>>, vector<24x1xf32>
    %93 = vector.broadcast %92 : vector<24x1xf32> to vector<24x256xf32>
    %94 = arith.mulf %91, %93 : vector<24x256xf32>
    %95 = arith.addf %75, %94 : vector<24x256xf32>
    %96 = arith.addf %95, %85 : vector<24x256xf32>
    %cst_36 = arith.constant 0.000000e+00 : f32
    %cst_37 = arith.constant 6.000000e+00 : f32
    %97 = vector.broadcast %cst_36 : f32 to vector<24x256xf32>
    %98 = arith.maximumf %97, %96 : vector<24x256xf32>
    %99 = vector.broadcast %cst_37 : f32 to vector<24x256xf32>
    %100 = arith.minimumf %99, %98 : vector<24x256xf32>
    %c0_38 = arith.constant 0 : index
    %c0_39 = arith.constant 0 : index
    %101 = vector.load %arg7[%c0_38, %c0_39] : memref<8x24xbf16, #tpu.memory_space<vmem>>, vector<8x24xbf16>
    %102 = arith.truncf %100 : vector<24x256xf32> to vector<24x256xbf16>
    %cst_40 = arith.constant dense<0.000000e+00> : vector<8x256xf32>
    %103 = tpu.matmul %101, %102, %cst_40 {dimension_numbers = #tpu.dot_dimension_numbers<[1], [0], [0], [1], [0, 0, 1, 1], [], []>} : vector<8x24xbf16>, vector<24x256xbf16>, vector<8x256xf32> -> vector<8x256xf32>
    %c0_41 = arith.constant 0 : index
    %c0_42 = arith.constant 0 : index
    %104 = vector.load %arg8[%c0_41, %c0_42] : memref<8x1xf32, #tpu.memory_space<vmem>>, vector<8x1xf32>
    %105 = vector.broadcast %104 : vector<8x1xf32> to vector<8x256xf32>
    %106 = arith.addf %103, %105 : vector<8x256xf32>
    %c0_43 = arith.constant 0 : index
    %c0_44 = arith.constant 0 : index
    %c0_45 = arith.constant 0 : index
    %107 = vector.load %arg9[%c0_43, %c0_44, %c0_45] : memref<1x8x256xf32, #tpu.memory_space<vmem>>, vector<1x8x256xf32>
    %108 = vector.shape_cast %107 : vector<1x8x256xf32> to vector<8x256xf32>
    %109 = vector.shape_cast %106 : vector<8x256xf32> to vector<1x8x256xf32>
    tpu.vector_store %arg9[%c0_43, %c0_44, %c0_45], %109 {strides = array<i32>} : memref<1x8x256xf32, #tpu.memory_space<vmem>>, vector<1x8x256xf32>,
    return
  }
  func.func @transform_0(%arg0: i32) -> (i32, i32, i32) {
    %c0_i32 = arith.constant 0 : i32
    %c0_i32_0 = arith.constant 0 : i32
    %c0_i32_1 = arith.constant 0 : i32
    return %arg0, %c0_i32, %c0_i32_0 : i32, i32, i32
  }
  func.func @transform_1(%arg0: i32) -> (i32, i32) {
    %c0_i32 = arith.constant 0 : i32
    %c0_i32_0 = arith.constant 0 : i32
    %c0_i32_1 = arith.constant 0 : i32
    return %c0_i32, %c0_i32_0 : i32, i32
  }
  func.func @transform_2(%arg0: i32) -> (i32, i32) {
    %c0_i32 = arith.constant 0 : i32
    %c0_i32_0 = arith.constant 0 : i32
    %c0_i32_1 = arith.constant 0 : i32
    return %c0_i32, %c0_i32_0 : i32, i32
  }
  func.func @transform_3(%arg0: i32) -> (i32, i32) {
    %c0_i32 = arith.constant 0 : i32
    %c0_i32_0 = arith.constant 0 : i32
    %c0_i32_1 = arith.constant 0 : i32
    return %c0_i32, %c0_i32_0 : i32, i32
  }
  func.func @transform_4(%arg0: i32) -> (i32, i32) {
    %c0_i32 = arith.constant 0 : i32
    %c0_i32_0 = arith.constant 0 : i32
    %c0_i32_1 = arith.constant 0 : i32
    return %c0_i32, %c0_i32_0 : i32, i32
  }
  func.func @transform_5(%arg0: i32) -> (i32, i32) {
    %c0_i32 = arith.constant 0 : i32
    %c0_i32_0 = arith.constant 0 : i32
    %c0_i32_1 = arith.constant 0 : i32
    return %c0_i32, %c0_i32_0 : i32, i32
  }
  func.func @transform_6(%arg0: i32) -> (i32, i32) {
    %c0_i32 = arith.constant 0 : i32
    %c0_i32_0 = arith.constant 0 : i32
    %c0_i32_1 = arith.constant 0 : i32
    return %c0_i32, %c0_i32_0 : i32, i32
  }
  func.func @transform_7(%arg0: i32) -> (i32, i32) {
    %c0_i32 = arith.constant 0 : i32
    %c0_i32_0 = arith.constant 0 : i32
    %c0_i32_1 = arith.constant 0 : i32
    return %c0_i32, %c0_i32_0 : i32, i32
  }
  func.func @transform_8(%arg0: i32) -> (i32, i32, i32) {
    %c0_i32 = arith.constant 0 : i32
    %c0_i32_0 = arith.constant 0 : i32
    %c0_i32_1 = arith.constant 0 : i32
    return %arg0, %c0_i32, %c0_i32_0 : i32, i32, i32
  }
}

</mosaic_0001>

<bundles_post_ra>
// kernel: tpu_custom_call.1
= control target key start
LH: loop header
LB: loop body
LE: loop exit
PB: predicated region body
PF: predicated region fallthrough
CT: control target
= control target key end

     0   :  { %13 = vsyncpa [#allocation3], 0  ;;  %s1933_s0 = inlined_call_operand.vmem [shape: bf16[2,4,256], index: 0, kind: input, shape index: {}]   ;;  %s1934_s1 = inlined_call_operand.vmem [shape: f32[8,256], index: 1, kind: input, shape index: {}]   ;;  %s1935_s2 = inlined_call_operand.vmem [shape: bf16[24,4], index: 2, kind: input, shape index: {}]   ;;  %s1936_s3 = inlined_call_operand.vmem [shape: f32[24,1], index: 3, kind: input, shape index: {}]   ;;  %s1937_s4 = inlined_call_operand.vmem [shape: f32[24,9], index: 4, kind: input, shape index: {}]   ;;  %s1938_s5 = inlined_call_operand.vmem [shape: f32[24,1], index: 5, kind: input, shape index: {}]   ;;  %s1939_s6 = inlined_call_operand.vmem [shape: bf16[8,24], index: 6, kind: input, shape index: {}]   ;;  %s1940_s7 = inlined_call_operand.vmem [shape: f32[8,1], index: 7, kind: input, shape index: {}]   ;;  %s1941_s8 = inlined_call_operand.hbm [shape: f32[2,8,256], index: 8, kind: output, shape index: {}]  }
   0x1   :  { %15 = vsyncpa [#allocation3 + $0x1], 0  ;;  %s1352_s27 = smov 0   ;;  %s1354_s28 = smov 0  }
   0x2   :  { %s1356_s29 = smov 0   ;;  %s1358_s30 = smov 0  }
   0x3 LB: > { %s1373_s9 = sadd.s32 4294967295, %s1288_s30   ;;  %s1110_s10 = sadd.s32 4294967294, %s1288_s30   ;;  %s1288_s30 = sphi %s1358_s30, %s1954_s30   ;;  %s1284_s29 = sphi %s1356_s29, %s1953_s29   ;;  %s1280_s28 = sphi %s1354_s28, %s1952_s28   ;;  %s1276_s27 = sphi %s1352_s27, %s1951_s27  }
   0x4   : > { %s1377_s11 = sadd.s32 1, %s1288_s30   ;;  %s201_s12 = sadd.s32 1, %s1284_s29 }
   0x5   : > { %s198_s13 = ssub.s32 %s1288_s30, %s1377_s11  ;;  %p211_p0 = scmp.ne.s32.totalorder %s1284_s29, %s1280_s28 }
   0x6   : > { %p199_p1 = scmp.eq.s32.totalorder %s198_s13, 0  ;;  %p212_p2 = scmp.eq.s32.totalorder %s1373_s9, 1 }
   0x7   : > { %p217_p3 = scmp.ne.s32.totalorder %s1280_s28, %s1276_s27  ;;  %p218_p4 = scmp.eq.s32.totalorder %s1110_s10, 1 }
   0x8   : > { %s1388_s14 = scalar_select %p199_p1, %s1284_s29, %s201_s12  }
   0x9   : > { %p1390_p5 = por %p212_p2, %p211_p0  ;;  %p1394_p6 = por %p218_p4, %p217_p3 }
   0xa   : > { %p1113_p7 = scmp.ge.s32.totalorder %s1288_s30, 1  ;;  %p265_p8 = scmp.lt.s32.totalorder %s1288_s30, 3 }
   0xc   : > { %p266_p9 = pnand %p1113_p7, %p265_p8 }
   0xe   : > { %269 = sbr.rel (%p266_p9) target bundleno = 604 (0x25c), region = 52 }
  0x13   : > { %v309_v0 = vld [vmem:[%s1936_s3] sm:$0xff]  ;;  %p299_p10 = scmp.lt.s32.totalorder %s1373_s9, 1  ;;  %v1290_v1 = vmov 0   ;;  %v311_v2 = vld [vmem:[%s1936_s3 + $0x10] sm:$0xff]  ;;  %v1291_v3 = vmov 4   ;;  %v1413_v4 = vld [vmem:[%s1937_s4 + $0x8] sm:$0xff] }
  0x14   : > { %1198 = vset.pattern.permute.xlu0 %v1290_v1  ;;  %1199 = vset.pattern.permute.xlu1 %v1290_v1  ;;  %v310_v6 = vld [vmem:[%s1936_s3 + $0x8] sm:$0xff]  ;;  %v1425_v7 = vld [vmem:[%s1937_s4 + $0x10] sm:$0xff]  ;;  %v1430_v8 = vld [vmem:[%s1937_s4] sm:$0xff]  ;;  %vm346_vm0 = vcmask 1041408   ;;  %vm339_vm1 = vcmask 31744   ;;  %v1292_v20 = vmov 1  }
  0x15   : > { %314 = vperm.xlu0 %1198, %v309_v0   ;;  %s300_s21 = scalar_select %p299_p10, %s1373_s9, 1  ;;  %324 = vperm.xlu1 %1199, %v311_v2   ;;  %v1140_v13 = vld [vmem:[%s1935_s2] sm:$0xff]  ;;  %v424_v15 = vld [vmem:[%s1938_s5 + $0x8] sm:$0xff]  ;;  %v425_v16 = vld [vmem:[%s1938_s5 + $0x10] sm:$0xff]  ;;  %v1293_v21 = vmov 3   ;;  %v1294_v22 = vmov 2  }
  0x16   : > { %1201 = vset.pattern.permute.xlu2 %v1291_v3  ;;  %v423_v14 = vld [vmem:[%s1938_s5] sm:$0xff]  ;;  %v308_v17 = vld [vmem:[%s1935_s2 + $0x8] sm:$0xf]  ;;  %v1295_v23 = vmov 5   ;;  %v1296_v24 = vmov 7   ;;  %v1297_v25 = vmov 8  }
  0x17   : > { %s1139_s24 = sshll.u32 %s300_s21, 2  ;;  %409 = vperm.xlu2 %1201, %v1413_v4   ;;  %v332_v18 = vunpack.c.l.b16 %v308_v17  ;;  %s1298_s18 = smov 127   ;;  %vm591_vm2 = vcmask 121856   ;;  %vm468_vm3 = vcmask 138240   ;;  %vm718_vm4 = vcmask 1039360  }
  0x18   : > { %s303_s10 = scalar_lea.vmem %s1933_s0, %s1139_s24  ;;  %s1299_s19 = smov 15   ;;  %vm526_vm5 = vcmask 130048   ;;  %vm656_vm6 = vcmask 7168   ;;  %vm783_vm7 = vcmask 924672   ;;  %vm913_vm8 = vcmask 908288  }
  0x19   : > { %v305_v5 = vld [vmem:[%s303_s10] sm:$0xf]  ;;  %v334_v19 = vpack.c.b16 %v332_v18, %v332_v18  ;;  %s1300_s20 = smov 17   ;;  %s1301_s21 = smov 1   ;;  %vm848_vm9 = vcmask 916480   ;;  %vm999_vm10 = vcmask 1043456  }
  0x1a   : > { %336 = vst [vmem:[#allocation1] ss:$4 sm:$0xff] %v305_v5  ;;  %s1302_s22 = smov 16   ;;  %s1303_s23 = smov 113   ;;  %vm995_vm11 = vcmask 195584  }
  0x1b   : > { %s1305_s24 = smov 112   ;;  %s1306_s25 = smov 111  }
  0x1d   : > { %319 = vperm.xlu0 %1198, %v310_v6   ;;  %1200 = vset.pattern.permute.xlu1 %v1291_v3 }
  0x1e   : > { %404 = vperm.xlu1 %1200, %v1430_v8  }
  0x1f   : > { %414 = vperm.xlu2 %1201, %v1425_v7  }
  0x21   : > { %v337_v9 = vld.sshfl [vmem:[#allocation1] sm:$0xff pattern:$0x73625140]  ;;  %v338_v10 = vld.sshfl [vmem:[#allocation1 + $0x8] sm:$0xff pattern:$0x73625140] }
  0x22   : > { %v347_v11 = vsel %vm346_vm0, %v337_v9, 0  ;;  %v349_v12 = vsel %vm346_vm0, %v338_v10, 0 }
  0x23   : > { %358 = vmatpush.bf16.msra.mxu0 %v347_v11  ;;  %376 = vmatpush.bf16.msra.mxu1 %v349_v12 }
  0x25   : > { %428 = vperm.xlu0 %1198, %v423_v14  }
  0x26   : > { %1121 = vmatmul.msk.bf16.vlgmr.msra.gmra.mxu0 %vm339_vm1, %v1140_v13  ;;  %1123 = vmatmul.msk.bf16.vlgmr.msra.gmra.mxu1 %vm339_vm1, %v1140_v13 }
  0x27   : > { %1202 = vset.pattern.permute.xlu1 %v1290_v1  ;;  %1203 = vset.pattern.permute.xlu2 %v1290_v1 }
  0x28   : > { %433 = vperm.xlu1 %1202, %v424_v15   ;;  %438 = vperm.xlu2 %1203, %v425_v16   ;;  %v1304_v16 = vmov 6  }
  0x2d   : > { %494 = vperm.xlu0 %1198, %v1430_v8  }
  0x30   : > { %502 = vperm.xlu2 %1203, %v1425_v7   ;;  %498 = vperm.xlu1 %1202, %v1413_v4  }
  0x35   : > { %1204 = vset.pattern.permute.xlu0 %v1292_v20 }
  0x36   : > { %1124 = vmatmul.msk.bf16.gmra.mxu1 %vm339_vm1, %v334_v19  ;;  %1122 = vmatmul.msk.bf16.gmra.mxu0 %vm339_vm1, %v334_v19 }
  0x37   : > { %553 = vperm.xlu0 %1204, %v1430_v8  }
  0x38   : > { %1206 = vset.pattern.permute.xlu2 %v1292_v20  ;;  %1205 = vset.pattern.permute.xlu1 %v1292_v20 }
  0x39   : > { %561 = vperm.xlu2 %1206, %v1425_v7   ;;  %557 = vperm.xlu1 %1205, %v1413_v4  }
  0x3f   : > { %1212 = vset.pattern.permute.xlu0 %v1294_v22 }
  0x40   : > { %618 = vperm.xlu0 %1212, %v1430_v8  }
  0x41   : > { %1208 = vset.pattern.permute.xlu2 %v1293_v21  ;;  %1207 = vset.pattern.permute.xlu1 %v1294_v22 }
  0x42   : > { %691 = vperm.xlu2 %1208, %v1425_v7   ;;  %626 = vperm.xlu1 %1207, %v1425_v7  }
  0x48   : > { %1213 = vset.pattern.permute.xlu0 %v1304_v16 }
  0x4a   : > { %1209 = vset.pattern.permute.xlu2 %v1295_v23  ;;  %1210 = vset.pattern.permute.xlu1 %v1296_v24 }
  0x4b   : > { %756 = vperm.xlu2 %1209, %v1425_v7   ;;  %886 = vperm.xlu1 %1210, %v1425_v7  }
  0x53   : > { %1211 = vset.pattern.permute.xlu2 %v1297_v25  ;;  %1214 = vset.pattern.permute.xlu1 %v1294_v22 }
  0x54   : > { %951 = vperm.xlu2 %1211, %v1425_v7  }
  0x5c   : > { %1215 = vset.pattern.permute.xlu2 %v1293_v21 }
  0x71   : > { %v410_v38 = vpop.permute.xlu2 %409 }
  0x79   : > { %v415_v52 = vpop.permute.xlu2 %414 }
  0x82   : > { %v439_v0 = vpop.permute.xlu2 %438 }
  0x87   : > { %v315_v26 = vpop.permute.xlu0 %314  ;;  %v325_v27 = vpop.permute.xlu1 %324 }
  0x8a   : > { %v1530_v13 = vpop.permute.xlu2 %502 }
  0x8f   : > { %v320_v28 = vpop.permute.xlu0 %319 }
  0x90   : > { %v405_v35 = vpop.permute.xlu1 %404 }
  0x93   : > { %v1539_v14 = vpop.permute.xlu2 %561 }
  0x97   : > { %v429_v39 = vpop.permute.xlu0 %428 }
  0x9a   : > { %v434_v53 = vpop.permute.xlu1 %433 }
  0x9c   : > { %v1545_v15 = vpop.permute.xlu2 %691 }
  0x9f   : > { %v495_v22 = vpop.permute.xlu0 %494 }
  0xa2   : > { %v1558_v18 = vpop.permute.xlu1 %498 }
  0xa3   : > { %v360_v29 = vpop.f32.mrf.mxu0  ;;  %v378_v30 = vpop.f32.mrf.mxu1 }
  0xa4   : > { %v361_v31 = vadd.f32 %v360_v29, %v315_v26  ;;  %v379_v32 = vadd.f32 %v378_v30, %v315_v26 }
  0xa5   : > { %v1552_v17 = vpop.permute.xlu2 %756 }
  0xa6   : > { %v387_v33 = vmax.f32 %v361_v31, 0.0  ;;  %v388_v34 = vmax.f32 %v379_v32, 0.0 }
  0xa8   : > { %v1472_v36 = vmin.f32 %v387_v33, 6.0  ;;  %v1474_v37 = vmin.f32 %v388_v34, 6.0 }
  0xaa   : > { %v417_v40 = vmul.f32 %v405_v35, %v1472_v36  ;;  %v418_v41 = vmul.f32 %v405_v35, %v1474_v37  ;;  %708 = vrot.lane.b32.xlu2 %v1474_v37, %s1298_s18  ;;  %576 = vrot.lane.b32.xlu1 %v1474_v37, %s1299_s19 }
  0xab   : > { %450 = vrot.lane.b32.xlu0 %v1474_v37, %s1300_s20  ;;  %v362_v42 = vpop.f32.mrf.mxu0  ;;  %v380_v43 = vpop.f32.mrf.mxu1 }
  0xac   : > { %v1484_v44 = vadd.f32 %v429_v39, %v417_v40  ;;  %v1486_v45 = vadd.f32 %v429_v39, %v418_v41  ;;  %v363_v46 = vadd.f32 %v362_v42, %v320_v28  ;;  %v381_v47 = vadd.f32 %v380_v43, %v320_v28  ;;  %v1566_v20 = vpop.permute.xlu1 %557  ;;  %v1575_v28 = vpop.permute.xlu0 %553  ;;  %v481_v39 = vld [vmem:[%s1934_s1] ss:$8 sm:$0x3]  ;;  %v1126_v40 = vld [vmem:[%s1934_s1 + $0x2] ss:$8 sm:$0x3] }
  0xad   : > { %v1611_v41 = vperm.slane %v481_v39, 0  ;;  %v1613_v42 = vperm.slane %v481_v39, 1  ;;  %v1615_v43 = vperm.slane %v1126_v40, 0 }
  0xae   : > { %v389_v48 = vmax.f32 %v363_v46, 0.0  ;;  %v390_v49 = vmax.f32 %v381_v47, 0.0  ;;  %v1563_v19 = vpop.permute.xlu2 %951  ;;  %v1617_v46 = vperm.slane %v1126_v40, 1 }
  0xb0   : > { %v1488_v50 = vmin.f32 %v389_v48, 6.0  ;;  %v1490_v51 = vmin.f32 %v390_v49, 6.0 }
  0xb2   : > { %v419_v54 = vmul.f32 %v410_v38, %v1488_v50  ;;  %v420_v55 = vmul.f32 %v410_v38, %v1490_v51  ;;  %578 = vrot.lane.b32.xlu2 %v1490_v51, %s1299_s19  ;;  %585 = vrot.lane.b32.xlu1 %v1472_v36, %s1299_s19 }
  0xb3   : > { %462 = vrot.lane.b32.xlu0 %v1472_v36, %s1300_s20  ;;  %v383_v56 = vpop.f32.mrf.mxu1  ;;  %v365_v57 = vpop.f32.mrf.mxu0 }
  0xb4   : > { %v1500_v58 = vadd.f32 %v434_v53, %v419_v54  ;;  %v1502_v59 = vadd.f32 %v434_v53, %v420_v55  ;;  %v384_v60 = vadd.f32 %v383_v56, %v325_v27  ;;  %v366_v62 = vadd.f32 %v365_v57, %v325_v27  ;;  %v1573_v27 = vpop.permute.xlu1 %626  ;;  %v619_v31 = vpop.permute.xlu0 %618 }
  0xb6   : > { %v392_v61 = vmax.f32 %v384_v60, 0.0  ;;  %v391_v3 = vmax.f32 %v366_v62, 0.0 }
  0xb8   : > { %v398_v63 = vmin.f32 %v392_v61, 6.0  ;;  %v397_v10 = vmin.f32 %v391_v3, 6.0 }
  0xba   : > { %587 = vrot.lane.b32.xlu2 %v1488_v50, %s1299_s19  ;;  %641 = vrot.lane.b32.xlu1 %v1474_v37, %s1301_s21  ;;  %v422_v2 = vmul.f32 %v415_v52, %v398_v63  ;;  %v421_v11 = vmul.f32 %v415_v52, %v397_v10 }
  0xbb   : > { %511 = vrot.lane.b32.xlu0 %v1474_v37, %s1302_s22  ;;  %v385_v5 = vpop.f32.mrf.mxu1  ;;  %v367_v6 = vpop.f32.mrf.mxu0 }
  0xbc   : > { %v1510_v9 = vadd.f32 %v439_v0, %v422_v2  ;;  %v1518_v12 = vadd.f32 %v439_v0, %v421_v11 }
  0xbd   : > { %v1582_v30 = vpop.permute.xlu1 %886 }
  0xc2   : > { %643 = vrot.lane.b32.xlu2 %v1490_v51, %s1301_s21  ;;  %706 = vrot.lane.b32.xlu1 %v1472_v36, %s1298_s18 }
  0xc3   : > { %520 = vrot.lane.b32.xlu0 %v1472_v36, %s1302_s22 }
  0xca   : > { %712 = vrot.lane.b32.xlu2 %v1490_v51, %s1298_s18  ;;  %773 = vrot.lane.b32.xlu1 %v1474_v37, %s1303_s23 }
  0xcb   : > { %650 = vrot.lane.b32.xlu0 %v1472_v36, %s1301_s21 }
  0xd2   : > { %775 = vrot.lane.b32.xlu2 %v1488_v50, %s1303_s23  ;;  %452 = vrot.lane.b32.xlu1 %v1490_v51, %s1300_s20 }
  0xd3   : > { %771 = vrot.lane.b32.xlu0 %v1472_v36, %s1303_s23 }
  0xda   : > { %454 = vrot.lane.b32.xlu2 %v398_v63, %s1300_s20  ;;  %464 = vrot.lane.b32.xlu1 %v1488_v50, %s1300_s20 }
  0xdb   : > { %777 = vrot.lane.b32.xlu0 %v1490_v51, %s1303_s23 }
  0xe2   : > { %466 = vrot.lane.b32.xlu2 %v397_v10, %s1300_s20  ;;  %513 = vrot.lane.b32.xlu1 %v1490_v51, %s1302_s22  ;;  %s296_s20 = sand.u32 1, %s1280_s28  }
  0xe3   : > { %580 = vrot.lane.b32.xlu0 %v398_v63, %s1299_s19  ;;  %s1035_s13 = scalar_lea.sflag [#allocation3], %s296_s20 }
  0xea   : > { %515 = vrot.lane.b32.xlu2 %v398_v63, %s1302_s22  ;;  %522 = vrot.lane.b32.xlu1 %v1488_v50, %s1302_s22 }
  0xeb   : > { %589 = vrot.lane.b32.xlu0 %v397_v10, %s1299_s19 }
  0xf2   : > { %524 = vrot.lane.b32.xlu2 %v397_v10, %s1302_s22  ;;  %652 = vrot.lane.b32.xlu1 %v1488_v50, %s1301_s21  ;;  %s1114_s22 = sshll.u32 %s296_s20, 4 }
  0xf3   : > { %714 = vrot.lane.b32.xlu0 %v397_v10, %s1298_s18  ;;  %s298_s26 = scalar_lea.vmem [#allocation2], %s1114_s22 }
  0xf4   : > { %s1048_s10 = sshll.u32 %s298_s26, 4  ;;  %s1049_s10 = int_to_ptr.vmem [resolvable:$true] %s1048_s10 }
  0xfa   : > { %654 = vrot.lane.b32.xlu2 %v397_v10, %s1301_s21  ;;  %710 = vrot.lane.b32.xlu1 %v1488_v50, %s1298_s18 }
  0xfb   : > { %781 = vrot.lane.b32.xlu0 %v398_v63, %s1303_s23 }
 0x102   : > { %779 = vrot.lane.b32.xlu2 %v397_v10, %s1303_s23  ;;  %645 = vrot.lane.b32.xlu1 %v398_v63, %s1301_s21  ;;  %s1141_s21 = sshll.u32 %s1373_s9, 4 }
 0x103   : > { %844 = vrot.lane.b32.xlu0 %v397_v10, %s1305_s24 }
 0x104   : > { %v1571_v26 = vpop.permute.xlu2 %708 }
 0x10a   : > { %909 = vrot.lane.b32.xlu2 %v397_v10, %s1306_s25  ;;  %716 = vrot.lane.b32.xlu1 %v398_v63, %s1298_s18  ;;  %v1125_v10 = vld [vmem:[%s1934_s1 + $0x1] ss:$8 sm:$0x3] }
 0x10b   : > { %911 = vrot.lane.b32.xlu0 %v398_v63, %s1306_s25 }
 0x10c   : > { %v579_v29 = vpop.permute.xlu2 %578 }
 0x112   : > { %683 = vperm.xlu2 %1215, %v1430_v8   ;;  %846 = vrot.lane.b32.xlu1 %v398_v63, %s1305_s24 }
 0x113   : > { %821 = vperm.xlu0 %1213, %v1425_v7  }
 0x114   : > { %v588_v32 = vpop.permute.xlu2 %587 }
 0x115   : > { %v1586_v33 = vsel %vm591_vm2, %v588_v32, %v579_v29  ;;  %v1589_v34 = vsel %vm591_vm2, %v579_v29, %v588_v32 }
 0x11a   : > { %836 = vrot.lane.b32.xlu2 %v1472_v36, %s1305_s24  ;;  %622 = vperm.xlu1 %1214, %v1413_v4  }
 0x11b   : > { %838 = vrot.lane.b32.xlu0 %v1474_v37, %s1305_s24  ;;  %1218 = vset.pattern.permute.xlu2 %v1295_v23 }
 0x11c   : > { %v577_v35 = vpop.permute.xlu1 %576  ;;  %v1597_v7 = vpop.permute.xlu2 %643 }
 0x11d   : > { %v451_v38 = vpop.permute.xlu0 %450 }
 0x122   : > { %842 = vrot.lane.b32.xlu2 %v1490_v51, %s1305_s24  ;;  %1216 = vset.pattern.permute.xlu1 %v1293_v21 }
 0x123   : > { %901 = vrot.lane.b32.xlu0 %v1472_v36, %s1306_s25  ;;  %687 = vperm.xlu1 %1216, %v1413_v4  }
 0x124   : > { %v1619_v47 = vpop.permute.xlu2 %712  ;;  %v586_v48 = vpop.permute.xlu1 %585 }
 0x125   : > { %v592_v49 = vsel %vm591_vm2, %v586_v48, %v577_v35  ;;  %v601_v21 = vsel %vm591_vm2, %v577_v35, %v586_v48  ;;  %v463_v52 = vpop.permute.xlu0 %462 }
 0x126   : > { %v611_v36 = vmul.f32 %v1615_v43, %v601_v21  ;;  %v612_v53 = vmul.f32 %v1617_v46, %v592_v49  ;;  %v469_v54 = vsel %vm468_vm3, %v463_v52, %v451_v38  ;;  %v478_v55 = vsel %vm468_vm3, %v451_v38, %v463_v52 }
 0x127   : > { %v487_v56 = vmul.f32 %v1611_v41, %v478_v55  ;;  %v488_v57 = vmul.f32 %v1613_v42, %v469_v54 }
 0x128   : > { %v629_v60 = vmul.f32 %v619_v31, %v611_v36  ;;  %v630_v61 = vmul.f32 %v619_v31, %v612_v53 }
 0x129   : > { %v505_v62 = vmul.f32 %v495_v22, %v487_v56  ;;  %v506_v63 = vmul.f32 %v495_v22, %v488_v57 }
 0x12a   : > { %905 = vrot.lane.b32.xlu2 %v1488_v50, %s1306_s25 }
 0x12b   : > { %907 = vrot.lane.b32.xlu0 %v1490_v51, %s1306_s25  ;;  %840 = vrot.lane.b32.xlu1 %v1488_v50, %s1305_s24  ;;  %v1635_v0 = vadd.f32 %v629_v60, %v505_v62  ;;  %v1637_v2 = vadd.f32 %v630_v61, %v506_v63  ;;  %v1647_v50 = vperm.slane %v1125_v10, 0  ;;  %v1649_v51 = vperm.slane %v1125_v10, 1 }
 0x12c   : > { %v776_v3 = vpop.permute.xlu2 %775  ;;  %v642_v5 = vpop.permute.xlu1 %641  ;;  %1217 = vset.pattern.permute.xlu1 %v1295_v23 }
 0x12d   : > { %v512_v6 = vpop.permute.xlu0 %511 }
 0x132   : > { %752 = vperm.xlu2 %1218, %v1413_v4  }
 0x133   : > { %813 = vperm.xlu0 %1213, %v1430_v8   ;;  %903 = vrot.lane.b32.xlu1 %v1474_v37, %s1306_s25  ;;  %s1046_s25 = scalar_lea.hbm %s1941_s8, %s1141_s21  ;;  %s1246_s21 = scalar_lea.hbm %s1941_s8, 32 }
 0x134   : > { %v1651_v11 = vpop.permute.xlu2 %454  ;;  %v707_v23 = vpop.permute.xlu1 %706  ;;  %s1050_s12 = sshll.u32 %s1046_s25, 4  ;;  %s1051_s12 = int_to_ptr.hbm [resolvable:$true] %s1050_s12 }
 0x135   : > { %v1655_v22 = vsel %vm718_vm4, %v707_v23, %v1571_v26  ;;  %v1659_v29 = vsel %vm718_vm4, %v1571_v26, %v707_v23  ;;  %v521_v31 = vpop.permute.xlu0 %520  ;;  %s1240_s9 = sshra.s32 %s1051_s12, 4  ;;  %s1241_s9 = int_to_ptr.hbm [resolvable:$true] %s1240_s9 }
 0x136   : > { %v527_v32 = vsel %vm526_vm5, %v521_v31, %v512_v6  ;;  %v536_v37 = vsel %vm526_vm5, %v512_v6, %v521_v31  ;;  %s1242_s17 = scalar_lea.hbm %s1241_s9, 16  ;;  %p1247_p0 = scmp.lt.s32.totalorder %s1241_s9, %s1941_s8 }
 0x137   : > { %v546_v35 = vmul.f32 %v1647_v50, %v536_v37  ;;  %v547_v38 = vmul.f32 %v1649_v51, %v527_v32  ;;  %p1243_p11 = scmp.ne.s32.totalorder %s1241_s9, %s1242_s17  ;;  %p1248_p1 = scmp.lt.s32.totalorder %s1246_s21, %s1242_s17 }
 0x139   : > { %v564_v39 = vmul.f32 %v1575_v28, %v546_v35  ;;  %v565_v40 = vmul.f32 %v1575_v28, %v547_v38  ;;  %v1127_v38 = vld [vmem:[%s1934_s1 + $0x3] ss:$8 sm:$0x3]  ;;  %p1244_p12 = pnand %p1243_p11, %p1390_p5  ;;  %p1249_p2 = por %p1248_p1, %p1247_p0 }
 0x13a   : > { %1220 = vset.pattern.permute.xlu2 %v1296_v24 }
 0x13b   : > { %1223 = vset.pattern.permute.xlu0 %v1297_v25  ;;  %878 = vperm.xlu2 %1220, %v1430_v8   ;;  %v570_v26 = vadd.f32 %v564_v39, %v1484_v44  ;;  %v571_v48 = vadd.f32 %v565_v40, %v1486_v45  ;;  %p1245_p13 = pneg %p1244_p12 }
 0x13c   : > { %748 = vperm.xlu1 %1217, %v1430_v8   ;;  %947 = vperm.xlu0 %1223, %v1413_v4   ;;  %v467_v49 = vpop.permute.xlu2 %466  ;;  %v774_v21 = vpop.permute.xlu1 %773 }
 0x13d   : > { %v651_v52 = vpop.permute.xlu0 %650  ;;  %p1250_p3 = pnand %p1249_p2, %p1245_p13 }
 0x13e   : > { %v657_v28 = vsel %vm656_vm6, %v651_v52, %v642_v5  ;;  %v666_v36 = vsel %vm656_vm6, %v642_v5, %v651_v52  ;;  %v1721_v52 = vperm.slane %v1127_v38, 0 }
 0x143   : > { %1222 = vset.pattern.permute.xlu2 %v1297_v25 }
 0x144   : > { %1219 = vset.pattern.permute.xlu1 %v1304_v16  ;;  %v516_v53 = vpop.permute.xlu2 %515  ;;  %v453_v44 = vpop.permute.xlu1 %452  ;;  %943 = vperm.xlu2 %1222, %v1430_v8  }
 0x145   : > { %817 = vperm.xlu1 %1219, %v1413_v4   ;;  %v772_v45 = vpop.permute.xlu0 %771  ;;  %1225 = vset.pattern.permute.xlu0 %v1290_v1 }
 0x146   : > { %v1682_v54 = vsel %vm783_vm7, %v772_v45, %v774_v21  ;;  %v1685_v55 = vsel %vm783_vm7, %v774_v21, %v772_v45 }
 0x14c   : > { %v525_v56 = vpop.permute.xlu2 %524  ;;  %v465_v57 = vpop.permute.xlu1 %464 }
 0x14d   : > { %1221 = vset.pattern.permute.xlu1 %v1296_v24  ;;  %v1689_v25 = vsel %vm468_vm3, %v465_v57, %v453_v44  ;;  %v1692_v8 = vsel %vm468_vm3, %v453_v44, %v465_v57  ;;  %v778_v16 = vpop.permute.xlu0 %777  ;;  %v1723_v44 = vperm.slane %v1127_v38, 1  ;;  %v529_v38 = vsel %vm526_vm5, %v525_v56, %v516_v53 }
 0x14e   : > { %882 = vperm.xlu1 %1221, %v1413_v4   ;;  %v1696_v60 = vsel %vm783_vm7, %v776_v3, %v778_v16  ;;  %v1699_v61 = vsel %vm783_vm7, %v778_v16, %v776_v3 }
 0x14f   : > { %1945 = vst [vmem:[#allocation5_spill] sm:$0xff] %v1696_v60 }
 0x150   : > { %1946 = vst [vmem:[#allocation6_spill] sm:$0xff] %v1699_v61 }
 0x154   : > { %v655_v62 = vpop.permute.xlu2 %654  ;;  %v514_v63 = vpop.permute.xlu1 %513 }
 0x155   : > { %v581_v5 = vpop.permute.xlu0 %580 }
 0x156   : > { %1224 = vset.pattern.permute.xlu1 %v1290_v1 }
 0x15c   : > { %v1702_v24 = vpop.permute.xlu2 %779  ;;  %v523_v6 = vpop.permute.xlu1 %522 }
 0x15d   : > { %v528_v10 = vsel %vm526_vm5, %v523_v6, %v514_v63  ;;  %v537_v23 = vsel %vm526_vm5, %v514_v63, %v523_v6  ;;  %v590_v31 = vpop.permute.xlu0 %589 }
 0x15e   : > { %v548_v4 = vmul.f32 %v1647_v50, %v537_v23  ;;  %v549_v32 = vmul.f32 %v1649_v51, %v528_v10  ;;  %v538_v23 = vsel %vm526_vm5, %v516_v53, %v525_v56 }
 0x160   : > { %v566_v3 = vmul.f32 %v1566_v20, %v548_v4  ;;  %v567_v37 = vmul.f32 %v1566_v20, %v549_v32  ;;  %v676_v20 = vmul.f32 %v1721_v52, %v666_v36  ;;  %v480_v4 = vsel %vm468_vm3, %v1651_v11, %v467_v49 }
 0x162   : > { %v1711_v35 = vadd.f32 %v566_v3, %v1500_v58  ;;  %v1714_v1 = vadd.f32 %v567_v37, %v1502_v59  ;;  %v677_v58 = vmul.f32 %v1723_v44, %v657_v28  ;;  %v471_v28 = vsel %vm468_vm3, %v467_v49, %v1651_v11 }
 0x163   : > { %v491_v37 = vmul.f32 %v1611_v41, %v480_v4  ;;  %v594_v11 = vsel %vm591_vm2, %v590_v31, %v581_v5  ;;  %v603_v49 = vsel %vm591_vm2, %v581_v5, %v590_v31 }
 0x164   : > { %v910_v39 = vpop.permute.xlu2 %909  ;;  %v1719_v40 = vpop.permute.xlu1 %652  ;;  %v615_v5 = vmul.f32 %v1615_v43, %v603_v49  ;;  %v490_v49 = vmul.f32 %v1613_v42, %v1689_v25 }
 0x165   : > { %v715_v21 = vpop.permute.xlu0 %714 }
 0x16c   : > { %v684_v45 = vpop.permute.xlu2 %683  ;;  %v1727_v57 = vpop.permute.xlu1 %710 }
 0x16d   : > { %v694_v59 = vmul.f32 %v684_v45, %v676_v20  ;;  %v695_v16 = vmul.f32 %v684_v45, %v677_v58  ;;  %v782_v63 = vpop.permute.xlu0 %781  ;;  %v492_v20 = vmul.f32 %v1613_v42, %v471_v28  ;;  %v1129_v58 = vld [vmem:[%s1934_s1 + $0x5] ss:$8 sm:$0x3] }
 0x16e   : > { %v1763_v4 = vperm.slane %v1129_v58, 0  ;;  %v1765_v28 = vperm.slane %v1129_v58, 1  ;;  %v786_v25 = vsel %vm783_vm7, %v1702_v24, %v782_v63 }
 0x16f   : > { %v1729_v6 = vadd.f32 %v694_v59, %v570_v26  ;;  %v1731_v10 = vadd.f32 %v695_v16, %v571_v48  ;;  %v1128_v26 = vld [vmem:[%s1934_s1 + $0x4] ss:$8 sm:$0x3]  ;;  %v550_v48 = vmul.f32 %v1647_v50, %v538_v23  ;;  %v551_v59 = vmul.f32 %v1649_v51, %v529_v38 }
 0x170   : > { %v1752_v45 = vperm.slane %v1128_v26, 0  ;;  %v1760_v56 = vperm.slane %v1128_v26, 1  ;;  %v509_v23 = vmul.f32 %v1530_v13, %v491_v37  ;;  %v510_v61 = vmul.f32 %v1530_v13, %v492_v20 }
 0x171   : > { %v568_v50 = vmul.f32 %v1539_v14, %v550_v48  ;;  %v616_v51 = vmul.f32 %v1617_v46, %v594_v11  ;;  %v569_v20 = vmul.f32 %v1539_v14, %v551_v59  ;;  %v489_v11 = vmul.f32 %v1611_v41, %v1692_v8  ;;  %v1130_v14 = vld [vmem:[%s1934_s1 + $0x6] ss:$8 sm:$0x3] }
 0x172   : > { %v798_v8 = vsel %vm783_vm7, %v782_v63, %v1702_v24 }
 0x173   : > { %v574_v58 = vadd.f32 %v568_v50, %v1518_v12  ;;  %v633_v12 = vmul.f32 %v1573_v27, %v615_v5  ;;  %v1805_v5 = vperm.slane %v1130_v14, 0 }
 0x174   : > { %v1736_v32 = vpop.permute.xlu2 %836  ;;  %v646_v36 = vpop.permute.xlu1 %645 }
 0x175   : > { %v1740_v3 = vpop.permute.xlu0 %844  ;;  %v659_v16 = vsel %vm656_vm6, %v655_v62, %v646_v36  ;;  %v668_v53 = vsel %vm656_vm6, %v646_v36, %v655_v62  ;;  %v1131_v62 = vld [vmem:[%s1934_s1 + $0x7] ss:$8 sm:$0x3]  ;;  %v639_v24 = vadd.f32 %v633_v12, %v509_v23 }
 0x176   : > { %v680_v36 = vmul.f32 %v1721_v52, %v668_v53  ;;  %v681_v26 = vmul.f32 %v1723_v44, %v659_v16  ;;  %v1787_v16 = vperm.slane %v1131_v62, 0  ;;  %v1789_v60 = vperm.slane %v1131_v62, 1 }
 0x178   : > { %v698_v59 = vmul.f32 %v1545_v15, %v680_v36  ;;  %v699_v50 = vmul.f32 %v1545_v15, %v681_v26  ;;  %v810_v36 = vmul.f32 %v1763_v4, %v786_v25  ;;  %v811_v15 = vmul.f32 %v1765_v28, %v798_v8 }
 0x17c   : > { %v1770_v31 = vpop.permute.xlu2 %842  ;;  %v717_v48 = vpop.permute.xlu1 %716 }
 0x17d   : > { %1947 = vst [vmem:[#allocation7_spill] sm:$0xff] %v1770_v31  ;;  %v721_v37 = vsel %vm718_vm4, %v715_v21, %v717_v48  ;;  %v733_v13 = vsel %vm718_vm4, %v717_v48, %v715_v21  ;;  %v912_v38 = vpop.permute.xlu0 %911  ;;  %v634_v21 = vmul.f32 %v1573_v27, %v616_v51  ;;  %v575_v48 = vadd.f32 %v569_v20, %v1510_v9 }
 0x17e   : > { %v745_v31 = vmul.f32 %v1752_v45, %v721_v37  ;;  %v746_v53 = vmul.f32 %v1760_v56, %v733_v13  ;;  %v916_v41 = vsel %vm913_vm8, %v910_v39, %v912_v38  ;;  %v928_v42 = vsel %vm913_vm8, %v912_v38, %v910_v39 }
 0x17f   : > { %v1807_v27 = vperm.slane %v1130_v14, 1  ;;  %v940_v62 = vmul.f32 %v1787_v16, %v916_v41  ;;  %v941_v37 = vmul.f32 %v1789_v60, %v928_v42  ;;  %v640_v63 = vadd.f32 %v634_v21, %v510_v61 }
 0x180   : > { %v763_v51 = vmul.f32 %v1552_v17, %v745_v31  ;;  %v764_v39 = vmul.f32 %v1552_v17, %v746_v53  ;;  %v704_v17 = vadd.f32 %v698_v59, %v574_v58  ;;  %v705_v38 = vadd.f32 %v699_v50, %v575_v48 }
 0x181   : > { %v958_v41 = vmul.f32 %v1563_v19, %v940_v62  ;;  %v959_v42 = vmul.f32 %v1563_v19, %v941_v37  ;;  %v720_v59 = vsel %vm718_vm4, %v1727_v57, %v1619_v47  ;;  %v732_v50 = vsel %vm718_vm4, %v1619_v47, %v1727_v57 }
 0x182   : > { %v769_v12 = vadd.f32 %v763_v51, %v639_v24  ;;  %v770_v21 = vadd.f32 %v764_v39, %v640_v63  ;;  %v613_v19 = vmul.f32 %v1615_v43, %v1589_v34  ;;  %v507_v37 = vmul.f32 %v1558_v18, %v489_v11 }
 0x183   : > { %v508_v24 = vmul.f32 %v1558_v18, %v490_v49  ;;  %v743_v47 = vmul.f32 %v1752_v45, %v720_v59  ;;  %v744_v57 = vmul.f32 %v1760_v56, %v732_v50 }
 0x184   : > { %v1815_v9 = vpop.permute.xlu2 %905  ;;  %v847_v26 = vpop.permute.xlu1 %846 }
 0x185   : > { %v851_v13 = vsel %vm848_vm9, %v1740_v3, %v847_v26  ;;  %v863_v31 = vsel %vm848_vm9, %v847_v26, %v1740_v3  ;;  %v822_v20 = vpop.permute.xlu0 %821 }
 0x186   : > { %v875_v53 = vmul.f32 %v1805_v5, %v851_v13  ;;  %v876_v61 = vmul.f32 %v1807_v27, %v863_v31  ;;  %v828_v23 = vmul.f32 %v822_v20, %v810_v36  ;;  %v829_v14 = vmul.f32 %v822_v20, %v811_v15 }
 0x188   : > { %v893_v25 = vmul.f32 %v1582_v30, %v875_v53  ;;  %v894_v8 = vmul.f32 %v1582_v30, %v876_v61  ;;  %v834_v3 = vadd.f32 %v828_v23, %v704_v17  ;;  %v835_v58 = vadd.f32 %v829_v14, %v705_v38 }
 0x189   : > { %v614_v30 = vmul.f32 %v1617_v46, %v1586_v33  ;;  %v658_v61 = vsel %vm656_vm6, %v1719_v40, %v1597_v7  ;;  %v667_v23 = vsel %vm656_vm6, %v1597_v7, %v1719_v40  ;;  %v806_v40 = vmul.f32 %v1763_v4, %v1682_v54 }
 0x18a   : > { %v899_v48 = vadd.f32 %v893_v25, %v769_v12  ;;  %v964_v51 = vadd.f32 %v958_v41, %v834_v3  ;;  %v900_v39 = vadd.f32 %v894_v8, %v770_v21  ;;  %v965_v62 = vadd.f32 %v959_v42, %v835_v58 }
 0x18b   : > { %v678_v42 = vmul.f32 %v1721_v52, %v667_v23  ;;  %v679_v25 = vmul.f32 %v1723_v44, %v658_v61  ;;  %v807_v52 = vmul.f32 %v1765_v28, %v1685_v55  ;;  %v1949_v23 = vld [vmem:[#allocation6_spill] sm:$0xff] }
 0x18c   : > { %v753_v63 = vpop.permute.xlu2 %752  ;;  %v623_v36 = vpop.permute.xlu1 %622  ;;  %v970_v15 = vadd.f32 %v964_v51, %v899_v48  ;;  %v971_v26 = vadd.f32 %v965_v62, %v900_v39 }
 0x18d   : > { %v631_v13 = vmul.f32 %v623_v36, %v613_v19  ;;  %v632_v31 = vmul.f32 %v623_v36, %v614_v30  ;;  %v839_v17 = vpop.permute.xlu0 %838  ;;  %v761_v43 = vmul.f32 %v753_v63, %v743_v47  ;;  %v762_v20 = vmul.f32 %v753_v63, %v744_v57 }
 0x18e   : > { %v976_v38 = vmax.f32 %v970_v15, 0.0  ;;  %v977_v34 = vmax.f32 %v971_v26, 0.0  ;;  %v849_v63 = vsel %vm848_vm9, %v1736_v32, %v839_v17  ;;  %v861_v54 = vsel %vm848_vm9, %v839_v17, %v1736_v32  ;;  %v989_v17 = vld [vmem:[%s1940_s7] sm:$0xff] }
 0x18f   : > { %v637_v33 = vadd.f32 %v631_v13, %v507_v37  ;;  %v638_v46 = vadd.f32 %v632_v31, %v508_v24  ;;  %v871_v26 = vmul.f32 %v1805_v5, %v849_v63  ;;  %v872_v47 = vmul.f32 %v1807_v27, %v861_v54  ;;  %992 = vperm.xlu1 %1224, %v989_v17  }
 0x190   : > { %v982_v11 = vmin.f32 %v976_v38, 6.0  ;;  %v983_v53 = vmin.f32 %v977_v34, 6.0 }
 0x191   : > { %v1841_v18 = vadd.f32 %v761_v43, %v637_v33  ;;  %v1843_v49 = vadd.f32 %v762_v20, %v638_v46 }
 0x192   : > { %v987_v14 = vpack.c.bf16 %v982_v11, %v982_v11  ;;  %v988_v12 = vpack.c.bf16 %v983_v53, %v983_v53  ;;  %v1948_v53 = vld [vmem:[#allocation5_spill] sm:$0xff] }
 0x193   : > { %v808_v61 = vmul.f32 %v1763_v4, %v1948_v53 }
 0x194   : > { %v1001_v21 = vsel %vm999_vm10, %v987_v14, 0  ;;  %v1004_v41 = vsel %vm999_vm10, %v988_v12, 0  ;;  %v809_v14 = vmul.f32 %v1765_v28, %v1949_v23 }
 0x195   : > { %v902_v8 = vpop.permute.xlu0 %901  ;;  %1012 = vmatpush.bf16.msra.mxu2 %v1001_v21  ;;  %1025 = vmatpush.bf16.msra.mxu3 %v1004_v41  ;;  %v688_v3 = vpop.permute.xlu1 %687 }
 0x196   : > { %v696_v58 = vmul.f32 %v688_v3, %v678_v42  ;;  %v697_v59 = vmul.f32 %v688_v3, %v679_v25  ;;  %v879_v39 = vpop.permute.xlu2 %878 }
 0x197   : > { %v889_v34 = vmul.f32 %v879_v39, %v871_v26  ;;  %v890_v43 = vmul.f32 %v879_v39, %v872_v47 }
 0x198   : > { %v702_v50 = vadd.f32 %v696_v58, %v1711_v35  ;;  %v703_v48 = vadd.f32 %v697_v59, %v1714_v1 }
 0x19d   : > { %v908_v51 = vpop.permute.xlu0 %907  ;;  %v841_v7 = vpop.permute.xlu1 %840 }
 0x19e   : > { %v944_v15 = vpop.permute.xlu2 %943  ;;  %v927_v25 = vsel %vm913_vm8, %v908_v51, %v1815_v9 }
 0x1a5   : > { %v814_v44 = vpop.permute.xlu0 %813  ;;  %v904_v30 = vpop.permute.xlu1 %903 }
 0x1a6   : > { %v824_v62 = vmul.f32 %v814_v44, %v806_v40  ;;  %v825_v19 = vmul.f32 %v814_v44, %v807_v52  ;;  %v914_v35 = vsel %vm913_vm8, %v902_v8, %v904_v30  ;;  %v926_v1 = vsel %vm913_vm8, %v904_v30, %v902_v8  ;;  %v1950_v8 = vld [vmem:[#allocation7_spill] sm:$0xff] }
 0x1a7   : > { %v936_v55 = vmul.f32 %v1787_v16, %v914_v35  ;;  %v937_v36 = vmul.f32 %v1789_v60, %v926_v1  ;;  %v850_v3 = vsel %vm848_vm9, %v841_v7, %v1950_v8  ;;  %v862_v4 = vsel %vm848_vm9, %v1950_v8, %v841_v7 }
 0x1a8   : > { %v830_v37 = vadd.f32 %v824_v62, %v1729_v6  ;;  %v831_v24 = vadd.f32 %v825_v19, %v1731_v10  ;;  %v741_v6 = vmul.f32 %v1752_v45, %v1655_v22  ;;  %v742_v10 = vmul.f32 %v1760_v56, %v1659_v29 }
 0x1a9   : > { %v954_v13 = vmul.f32 %v944_v15, %v936_v55  ;;  %v955_v31 = vmul.f32 %v944_v15, %v937_v36  ;;  %v873_v28 = vmul.f32 %v1805_v5, %v850_v3  ;;  %v874_v59 = vmul.f32 %v1807_v27, %v862_v4 }
 0x1ab   : > { %v960_v29 = vadd.f32 %v954_v13, %v830_v37  ;;  %v961_v56 = vadd.f32 %v955_v31, %v831_v24 }
 0x1ae   : > { %v749_v57 = vpop.permute.xlu1 %748  ;;  %v948_v58 = vpop.permute.xlu0 %947 }
 0x1af   : > { %v759_v38 = vmul.f32 %v749_v57, %v741_v6  ;;  %v760_v32 = vmul.f32 %v749_v57, %v742_v10 }
 0x1b1   : > { %v765_v22 = vadd.f32 %v759_v38, %v1635_v0  ;;  %v766_v45 = vadd.f32 %v760_v32, %v1637_v2  ;;  %v915_v2 = vsel %vm913_vm8, %v1815_v9, %v908_v51 }
 0x1b3   : > { %v895_v20 = vadd.f32 %v889_v34, %v765_v22  ;;  %v896_v33 = vadd.f32 %v890_v43, %v766_v45 }
 0x1b5   : > { %v966_v46 = vadd.f32 %v960_v29, %v895_v20  ;;  %v967_v11 = vadd.f32 %v961_v56, %v896_v33 }
 0x1b7   : > { %v818_v12 = vpop.permute.xlu1 %817  ;;  %v972_v37 = vmax.f32 %v966_v46, 0.0  ;;  %v973_v27 = vmax.f32 %v967_v11, 0.0 }
 0x1b8   : > { %v826_v21 = vmul.f32 %v818_v12, %v808_v61  ;;  %v827_v41 = vmul.f32 %v818_v12, %v809_v14 }
 0x1b9   : > { %v979_v1 = vmin.f32 %v973_v27, 6.0 }
 0x1ba   : > { %v832_v42 = vadd.f32 %v826_v21, %v702_v50  ;;  %v833_v0 = vadd.f32 %v827_v41, %v703_v48  ;;  %v938_v50 = vmul.f32 %v1787_v16, %v915_v2  ;;  %v939_v48 = vmul.f32 %v1789_v60, %v927_v25 }
 0x1bb   : > { %v978_v60 = vmin.f32 %v972_v37, 6.0 }
 0x1bc   : > { %v956_v52 = vmul.f32 %v948_v58, %v938_v50  ;;  %v957_v39 = vmul.f32 %v948_v58, %v939_v48 }
 0x1be   : > { %v962_v51 = vadd.f32 %v956_v52, %v832_v42  ;;  %v963_v62 = vadd.f32 %v957_v39, %v833_v0 }
 0x1c0   : > { %v883_v40 = vpop.permute.xlu1 %882 }
 0x1c1   : > { %v891_v44 = vmul.f32 %v883_v40, %v873_v28  ;;  %v892_v9 = vmul.f32 %v883_v40, %v874_v59 }
 0x1c3   : > { %v897_v19 = vadd.f32 %v891_v44, %v1841_v18  ;;  %v898_v7 = vadd.f32 %v892_v9, %v1843_v49  ;;  %v984_v18 = vld [vmem:[%s1939_s6] sm:$0xf] }
 0x1c5   : > { %v968_v30 = vadd.f32 %v962_v51, %v897_v19  ;;  %v969_v5 = vadd.f32 %v963_v62, %v898_v7 }
 0x1c7   : > { %v974_v16 = vmax.f32 %v968_v30, 0.0  ;;  %v975_v24 = vmax.f32 %v969_v5, 0.0 }
 0x1c9   : > { %v980_v35 = vmin.f32 %v974_v16, 6.0  ;;  %v981_v63 = vmin.f32 %v975_v24, 6.0 }
 0x1cb   : > { %v985_v54 = vpack.c.bf16 %v980_v35, %v978_v60  ;;  %v986_v55 = vpack.c.bf16 %v981_v63, %v979_v1 }
 0x1cd   : > { %1013 = vmatpush.bf16.msra.mxu2 %v985_v54  ;;  %1026 = vmatpush.bf16.msra.mxu3 %v986_v55 }
 0x1d0   : > { %1132 = vmatmul.msk.bf16.vlgmr.msra.gmra.mxu2 %vm995_vm11, %v984_v18  ;;  %1133 = vmatmul.msk.bf16.vlgmr.msra.gmra.mxu3 %vm995_vm11, %v984_v18 }
 0x201   : > { %v993_v49 = vpop.permute.xlu1 %992 }
 0x253   : > { %v1015_v36 = vpop.f32.mrf.mxu2  ;;  %v1028_v15 = vpop.f32.mrf.mxu3 }
 0x254   : > { %v1016_v6 = vadd.f32 %v1015_v36, %v993_v49  ;;  %v1029_v10 = vadd.f32 %v1028_v15, %v993_v49 }
 0x256   : > { %1032 = vst [vmem:[%s298_s26] sm:$0xff] %v1016_v6 }
 0x257   : > { %1033 = vst [vmem:[%s298_s26 + $0x8] sm:$0xff] %v1029_v10 }
 0x258   : > { %1253 = shalt.err (!%p1250_p3)
}
 0x259   : > { %1142 = dma.vmem_to_hbm [thread:$0]  (%p1390_p5), %s1049_s10, 256, %s1051_s12, %s1035_s13  }
 0x25b   : > { %v1017_v26 = vpop.f32.mrf.mxu2  ;;  %v1030_v47 = vpop.f32.mrf.mxu3 }
 0x25c PF: > { %p1148_p4 = scmp.ge.s32.totalorder %s1288_s30, 2  ;;  %s1062_s20 = sand.u32 1, %s1276_s27  }
 0x25d   : > { %s1063_s24 = scalar_lea.sflag [#allocation3], %s1062_s20 }
 0x25e   : > { %p1145_p7 = pnand %p1148_p4, %p1394_p6 }
 0x260   : > { %p1146_p8 = pneg %p1145_p7 }
 0x262   : > { %1271 = dma.done.wait (%p1146_p8), %s1063_s24, 256  }
 0x263   : > { %1273 = vsyncadd (%p1146_p8), %s1063_s24, 4294967040  ;;  %p18_p5 = scmp.ge.s32.totalorder %s1377_s11, 4   ;;  %s1951_s27 = smov %s1280_s28 }
 0x264   : > { %s1952_s28 = smov %s1284_s29  ;;  %s1953_s29 = smov %s1388_s14 }
 0x265   : > { %s1954_s30 = smov %s1377_s11  ;;  %20 = sbr.rel (!%p18_p5) target bundleno = 3 (0x3), region = 94 }
 0x26a   :  { %1069 = vsyncpa [#allocation3], 1 }
 0x26b   :  { %1071 = vsyncpa [#allocation3 + $0x1], 1 }

</bundles_post_ra>
